<compile_context>
chip_gen: v7x
topology: tpu7x:2x2x1
jax: 0.10.0
libtpu: 0.0.40
codegen_flags: <defaults>
</compile_context>

<pallas_src>
import jax
import jax.numpy as jnp
from jax.experimental import pallas as pl
from jax.experimental.pallas import tpu as pltpu

_LANE = 128
_SUBLANE = 8
_DEFAULT_BATCH_TILE = 2048   # rows per grid step on the large-batch path
_NO_GRID_MAX_ROWS = 128      # at/below this many (padded) rows: single tile, no grid machinery


def _round_up(x, m):
    return (x + m - 1) // m * m


def _decoder_kernel(z_ref, w1_ref, b1_ref, w2_ref, b2_ref, w3_ref, b3_ref, o_ref):
    # bf16 operands into the MXU, f32 accumulation; epilogue (bias/ReLU/sigmoid) stays f32.
    z = z_ref[...].astype(jnp.bfloat16)

    h1 = jnp.dot(z, w1_ref[...], preferred_element_type=jnp.float32) + b1_ref[...]
    h1 = jnp.maximum(h1, 0.0)

    h2 = jnp.dot(h1.astype(jnp.bfloat16), w2_ref[...],
                 preferred_element_type=jnp.float32) + b2_ref[...]
    h2 = jnp.maximum(h2, 0.0)

    # Final layer is only L_in (=16) columns wide: no padded columns are computed, stored,
    # or pushed through the EUP.
    logits = jnp.dot(h2.astype(jnp.bfloat16), w3_ref[...],
                     preferred_element_type=jnp.float32) + b3_ref[...]
    o_ref[...] = jax.nn.sigmoid(logits)


def prepare_params(params):
    """One-time parameter prep (hoisted out of the per-call path).

    Weights -> bf16 (MXU-native, halves weight DMA bytes); biases stay f32 as (1, out) rows.
    """
    return {
        "w1": params["w1"].astype(jnp.bfloat16),
        "b1": params["b1"].astype(jnp.float32).reshape(1, -1),
        "w2": params["w2"].astype(jnp.bfloat16),
        "b2": params["b2"].astype(jnp.float32).reshape(1, -1),
        "w3": params["w3"].astype(jnp.bfloat16),
        "b3": params["b3"].astype(jnp.float32).reshape(1, -1),
    }


def decoder_seqpooled_forward(z, prepared, img_size, *,
                              max_batch_tile=_DEFAULT_BATCH_TILE,
                              no_grid_max_rows=_NO_GRID_MAX_ROWS):
    """Pallas implementation of DecoderSeqpooled.forward.

    z:        (B, latent_dim) float32
    prepared: output of prepare_params() -- w1 (latent_dim,256) bf16, b1 (1,256) f32,
              w2 (256,256) bf16, b2 (1,256) f32, w3 (256,L_in) bf16, b3 (1,L_in) f32
              (weights stored (in, out) so x @ W + b).
    returns:  (B, L_in, 1) float32
    """
    B, latent_dim = z.shape
    L_in = img_size[0]
    w1, b1 = prepared["w1"], prepared["b1"]
    w2, b2 = prepared["w2"], prepared["b2"]
    w3, b3 = prepared["w3"], prepared["b3"]

    # Pad rows to a full sublane group only (never to the batch tile).
    Bp = _round_up(max(B, _SUBLANE), _SUBLANE)
    zp = z if Bp == B else jnp.pad(z, ((0, Bp - B), (0, 0)))

    if Bp <= no_grid_max_rows:
        # Single tile: no grid, no per-step pipeline machinery for a ~0.1 MFLOP kernel.
        out = pl.pallas_call(
            _decoder_kernel,
            out_shape=jax.ShapeDtypeStruct((Bp, L_in), jnp.float32),
        )(zp, w1, b1, w2, b2, w3, b3)
    else:
        # Grid over batch tiles; weights/biases resident in VMEM across iterations.
        # TB <= cdiv(Bp, 2) guarantees >= 2 grid steps so "parallel" can use both TCs on v7x.
        TB = min(_round_up(max_batch_tile, _SUBLANE),
                 _round_up(pl.cdiv(Bp, 2), _SUBLANE))
        grid_steps = pl.cdiv(Bp, TB)  # last tile may be ragged; Pallas masks the boundary block

        def resident(arr):
            nd = arr.ndim
            return pl.BlockSpec(arr.shape, lambda i, _nd=nd: (0,) * _nd)

        out = pl.pallas_call(
            _decoder_kernel,
            out_shape=jax.ShapeDtypeStruct((Bp, L_in), jnp.float32),
            grid=(grid_steps,),
            in_specs=[
                pl.BlockSpec((TB, latent_dim), lambda i: (i, 0)),
                resident(w1), resident(b1),
                resident(w2), resident(b2),
                resident(w3), resident(b3),
            ],
            out_specs=pl.BlockSpec((TB, L_in), lambda i: (i, 0)),
            compiler_params=pltpu.CompilerParams(
                dimension_semantics=("parallel",),  # shard batch tiles across TCs (v7x megacore)
            ),
        )(zp, w1, b1, w2, b2, w3, b3)

    out = out if Bp == B else out[:B]
    return out.reshape(B, L_in, 1)


def init_params(key, latent_dim, hidden_dim, L_in):
    """Deterministic raw (f32) parameters matching the module's nn.Linear layers, stored (in, out)."""
    k1, k2, k3, k4, k5, k6 = jax.random.split(key, 6)
    scale = 0.1
    return {
        "w1": scale * jax.random.normal(k1, (latent_dim, hidden_dim), jnp.float32),
        "b1": scale * jax.random.normal(k2, (1, hidden_dim), jnp.float32),
        "w2": scale * jax.random.normal(k3, (hidden_dim, hidden_dim), jnp.float32),
        "b2": scale * jax.random.normal(k4, (1, hidden_dim), jnp.float32),
        "w3": scale * jax.random.normal(k5, (hidden_dim, L_in), jnp.float32),
        "b3": scale * jax.random.normal(k6, (1, L_in), jnp.float32),
    }


if __name__ == "__main__":
    # Module config: img_size = (L_in, n_chan); only L_in matters for the decoder output width.
    img_size = (16, 4)
    latent_dim = 10
    hidden_dim = 256
    batch = 2

    key = jax.random.PRNGKey(0)
    kz, kp = jax.random.split(key)
    z = jax.random.normal(kz, (batch, latent_dim), jnp.float32)
    params = init_params(kp, latent_dim, hidden_dim, img_size[0])
    prepared = prepare_params(params)  # one-time weight prep, hoisted out of the forward path

    def ref_forward(zz):
        h = jnp.maximum(zz @ params["w1"] + params["b1"], 0.0)
        h = jnp.maximum(h @ params["w2"] + params["b2"], 0.0)
        return jax.nn.sigmoid(h @ params["w3"] + params["b3"]).reshape(
            zz.shape[0], img_size[0], 1)

    # 1) Tiny-batch (no-grid) path.
    out = jax.block_until_ready(decoder_seqpooled_forward(z, prepared, img_size))
    ref = ref_forward(z)
    assert out.shape == (batch, img_size[0], 1)
    assert jnp.allclose(out, ref, atol=2e-2), "mismatch vs reference (no-grid path)"

    # 2) Gridded path, tile divides padded batch (B=20 -> Bp=24, TB=8, 3 steps).
    batch_big = 20
    z_big = jax.random.normal(jax.random.fold_in(kz, 1), (batch_big, latent_dim), jnp.float32)
    ref_big = ref_forward(z_big)
    out_big = jax.block_until_ready(
        decoder_seqpooled_forward(z_big, prepared, img_size,
                                  max_batch_tile=8, no_grid_max_rows=0))
    assert out_big.shape == (batch_big, img_size[0], 1)
    assert jnp.allclose(out_big, ref_big, atol=2e-2), "mismatch vs reference (gridded path)"

    # 3) Gridded path with a ragged last tile (B=20 -> Bp=24, TB=16, 2 steps, last block partial).
    out_rag = jax.block_until_ready(
        decoder_seqpooled_forward(z_big, prepared, img_size,
                                  max_batch_tile=16, no_grid_max_rows=0))
    assert out_rag.shape == (batch_big, img_size[0], 1)
    assert jnp.allclose(out_rag, ref_big, atol=2e-2), "mismatch vs reference (ragged-tile path)"

    print("KERNEL_OK")
</pallas_src>

<mosaic_0001>
module attributes {stable_mosaic.version = 11 : i64} {
  func.func @_decoder_kernel(%arg0: memref<8x10xf32, #tpu.memory_space<vmem>>, %arg1: memref<10x256xbf16, #tpu.memory_space<vmem>>, %arg2: memref<1x256xf32, #tpu.memory_space<vmem>>, %arg3: memref<256x256xbf16, #tpu.memory_space<vmem>>, %arg4: memref<1x256xf32, #tpu.memory_space<vmem>>, %arg5: memref<256x16xbf16, #tpu.memory_space<vmem>>, %arg6: memref<1x16xf32, #tpu.memory_space<vmem>>, %arg7: memref<8x16xf32, #tpu.memory_space<vmem>>) attributes {dimension_semantics = [], scalar_prefetch = 0 : i64, scratch_operands = 0 : i64, tpu.core_type = #tpu.core_type<tc>} {
    %c0 = arith.constant 0 : index
    %c0_0 = arith.constant 0 : index
    %0 = vector.load %arg0[%c0, %c0_0] : memref<8x10xf32, #tpu.memory_space<vmem>>, vector<8x10xf32>
    %1 = arith.truncf %0 : vector<8x10xf32> to vector<8x10xbf16>
    %c0_1 = arith.constant 0 : index
    %c0_2 = arith.constant 0 : index
    %2 = vector.load %arg1[%c0_1, %c0_2] : memref<10x256xbf16, #tpu.memory_space<vmem>>, vector<10x256xbf16>
    %cst = arith.constant dense<0.000000e+00> : vector<8x256xf32>
    %3 = tpu.matmul %1, %2, %cst {dimension_numbers = #tpu.dot_dimension_numbers<[1], [0], [0], [1], [0, 0, 1, 1], [], []>} : vector<8x10xbf16>, vector<10x256xbf16>, vector<8x256xf32> -> vector<8x256xf32>
    %c0_3 = arith.constant 0 : index
    %c0_4 = arith.constant 0 : index
    %4 = vector.load %arg2[%c0_3, %c0_4] : memref<1x256xf32, #tpu.memory_space<vmem>>, vector<1x256xf32>
    %5 = vector.broadcast %4 : vector<1x256xf32> to vector<8x256xf32>
    %6 = arith.addf %3, %5 : vector<8x256xf32>
    %cst_5 = arith.constant 0.000000e+00 : f32
    %7 = vector.broadcast %cst_5 : f32 to vector<8x256xf32>
    %8 = arith.maximumf %6, %7 : vector<8x256xf32>
    %9 = arith.truncf %8 : vector<8x256xf32> to vector<8x256xbf16>
    %c0_6 = arith.constant 0 : index
    %c0_7 = arith.constant 0 : index
    %10 = vector.load %arg3[%c0_6, %c0_7] : memref<256x256xbf16, #tpu.memory_space<vmem>>, vector<256x256xbf16>
    %cst_8 = arith.constant dense<0.000000e+00> : vector<8x256xf32>
    %11 = tpu.matmul %9, %10, %cst_8 {dimension_numbers = #tpu.dot_dimension_numbers<[1], [0], [0], [1], [0, 0, 1, 1], [], []>} : vector<8x256xbf16>, vector<256x256xbf16>, vector<8x256xf32> -> vector<8x256xf32>
    %c0_9 = arith.constant 0 : index
    %c0_10 = arith.constant 0 : index
    %12 = vector.load %arg4[%c0_9, %c0_10] : memref<1x256xf32, #tpu.memory_space<vmem>>, vector<1x256xf32>
    %13 = vector.broadcast %12 : vector<1x256xf32> to vector<8x256xf32>
    %14 = arith.addf %11, %13 : vector<8x256xf32>
    %cst_11 = arith.constant 0.000000e+00 : f32
    %15 = vector.broadcast %cst_11 : f32 to vector<8x256xf32>
    %16 = arith.maximumf %14, %15 : vector<8x256xf32>
    %17 = arith.truncf %16 : vector<8x256xf32> to vector<8x256xbf16>
    %c0_12 = arith.constant 0 : index
    %c0_13 = arith.constant 0 : index
    %18 = vector.load %arg5[%c0_12, %c0_13] : memref<256x16xbf16, #tpu.memory_space<vmem>>, vector<256x16xbf16>
    %cst_14 = arith.constant dense<0.000000e+00> : vector<8x16xf32>
    %19 = tpu.matmul %17, %18, %cst_14 {dimension_numbers = #tpu.dot_dimension_numbers<[1], [0], [0], [1], [0, 0, 1, 1], [], []>} : vector<8x256xbf16>, vector<256x16xbf16>, vector<8x16xf32> -> vector<8x16xf32>
    %c0_15 = arith.constant 0 : index
    %c0_16 = arith.constant 0 : index
    %20 = vector.load %arg6[%c0_15, %c0_16] : memref<1x16xf32, #tpu.memory_space<vmem>>, vector<1x16xf32>
    %21 = vector.broadcast %20 : vector<1x16xf32> to vector<8x16xf32>
    %22 = arith.addf %19, %21 : vector<8x16xf32>
    %23 = arith.negf %22 : vector<8x16xf32>
    %24 = math.exp %23 : vector<8x16xf32>
    %cst_17 = arith.constant 1.000000e+00 : f32
    %25 = vector.broadcast %cst_17 : f32 to vector<8x16xf32>
    %26 = arith.addf %25, %24 : vector<8x16xf32>
    %27 = arith.divf %25, %26 : vector<8x16xf32>
    %c0_18 = arith.constant 0 : index
    %c0_19 = arith.constant 0 : index
    %28 = vector.load %arg7[%c0_18, %c0_19] : memref<8x16xf32, #tpu.memory_space<vmem>>, vector<8x16xf32>
    tpu.vector_store %arg7[%c0_18, %c0_19], %27 {strides = array<i32>} : memref<8x16xf32, #tpu.memory_space<vmem>>, vector<8x16xf32>,
    return
  }
}

</mosaic_0001>

<bundles_post_ra>
// kernel: tpu_custom_call.1
= control target key start
LH: loop header
LB: loop body
LE: loop exit
PB: predicated region body
PF: predicated region fallthrough
CT: control target
= control target key end

     0   :  { %12 = vsyncpa [#allocation3], 0  ;;  %s904_s0 = inlined_call_operand.vmem [shape: f32[8,10], index: 0, kind: input, shape index: {}]   ;;  %s905_s1 = inlined_call_operand.vmem [shape: bf16[10,256], index: 1, kind: input, shape index: {}]   ;;  %s906_s2 = inlined_call_operand.vmem [shape: f32[1,256], index: 2, kind: input, shape index: {}]   ;;  %s907_s3 = inlined_call_operand.hbm [shape: bf16[256,256], index: 3, kind: input, shape index: {}]   ;;  %s908_s4 = inlined_call_operand.vmem [shape: f32[1,256], index: 4, kind: input, shape index: {}]   ;;  %s909_s5 = inlined_call_operand.vmem [shape: bf16[256,16], index: 5, kind: input, shape index: {}]   ;;  %s910_s6 = inlined_call_operand.vmem [shape: f32[1,16], index: 6, kind: input, shape index: {}]   ;;  %s911_s7 = inlined_call_operand.hbm [shape: f32[8,16], index: 7, kind: output, shape index: {}]  }
   0x1   :  { %13 = vsyncpa [#allocation4], 0  ;;  %s769_s24 = smov [#allocation2]   ;;  %s721_s28 = scalar_lea.hbm %s907_s3, 4096 }
   0x2   :  { %s25_s25 = sshll.u32 %s769_s24, 4  ;;  %p722_p0 = scmp.ne.s32.totalorder %s907_s3, %s721_s28  ;;  %s26_s25 = int_to_ptr.vmem [resolvable:$true] %s25_s25 }
   0x3   :  { %p725_p1 = scmp.lt.u32.totalorder %s721_s28, %s907_s3 }
   0x5   :  { %p727_p2 = pnand %p725_p1, %p722_p0 }
   0x7   :  { %730 = shalt.err (!%p727_p2)
}
   0x8   :  { %s731_s10 = scalar_lea.vmem %s26_s25, 4096  ;;  %p736_p4 = scmp.lt.s32.totalorder %s26_s25, %s26_s25 }
   0x9   :  { %p732_p3 = scmp.ne.s32.totalorder %s26_s25, %s731_s10  ;;  %p737_p5 = scmp.lt.s32.totalorder %s731_s10, %s731_s10 }
   0xb   :  { %p738_p6 = por %p737_p5, %p736_p4 }
   0xd   :  { %p739_p7 = pnand %p738_p6, %p732_p3 }
   0xf   :  { %742 = shalt.err (!%p739_p7)
}
  0x10   :  { %s770_s11 = smov 128   ;;  %s771_s12 = smov 8  }
  0x11   :  { %31 = dma.hbm_to_vmem [thread:$0]  %s907_s3, 4096, %s26_s25, [#allocation3], %s770_s11, %s770_s11, %s771_s12  }
  0x12   :  { %765 = dma.done.wait [#allocation3], 4096  }
  0x13   :  { %766 = vsyncadd [#allocation3], 4294963200  ;;  %v772_v0 = vmov 0   ;;  %vm70_vm0 = vcmask 1044480   ;;  %v42_v3 = vld [vmem:[%s904_s0] sm:$0xff]  ;;  %vm66_vm1 = vcmask 80896   ;;  %v48_v50 = vlaneseq }
  0x14   :  { %109 = vmatprep.mubr.bf16.mxu0 %v772_v0  ;;  %v650_v1 = vld [vmem:[%s905_s1 + $0x4] ss:$8 sps:$4 sm:$0x1f]   ;;  %v652_v2 = vld [vmem:[%s905_s1] ss:$8 sps:$4 sm:$0x1f]   ;;  %v43_v7 = vpack.c.bf16 %v42_v3, %v42_v3 }
  0x15   :  { %571 = vmatprep.subr.msk.bf16.mxu0 %vm70_vm0, %v650_v1  ;;  %v653_v4 = vld [vmem:[#allocation2 + $0x4] ss:$8 sps:$4 sm:$0xff]   ;;  %v655_v5 = vld [vmem:[#allocation2] ss:$8 sps:$4 sm:$0xff]   ;;  %v72_v6 = vsel %vm70_vm0, %v652_v2, 0  ;;  %v705_v42 = vld [vmem:[%s909_s5 + $0x50] sm:$0xff]  }
  0x16   :  { %v656_v8 = vld [vmem:[#allocation2 + $0x14] ss:$8 sps:$4 sm:$0xff]   ;;  %78 = vmatpush1.bf16.msra.mxu0 %v72_v6  ;;  %326 = vmatprep.subr.bf16.mxu1 %v653_v4  ;;  %v658_v9 = vld [vmem:[#allocation2 + $0x10] ss:$8 sps:$4 sm:$0xff]   ;;  %v659_v10 = vld [vmem:[#allocation2 + $0x24] ss:$8 sps:$4 sm:$0xff]  }
  0x17   :  { %327 = vmatpush1.bf16.msra.mxu1 %v655_v5  ;;  %v661_v11 = vld [vmem:[#allocation2 + $0x20] ss:$8 sps:$4 sm:$0xff]   ;;  %v662_v12 = vld [vmem:[#allocation2 + $0x34] ss:$8 sps:$4 sm:$0xff]   ;;  %v664_v13 = vld [vmem:[#allocation2 + $0x30] ss:$8 sps:$4 sm:$0xff]  }
  0x18   :  { %328 = vmatprep.subr.bf16.mxu1 %v656_v8  ;;  %v665_v14 = vld [vmem:[#allocation2 + $0x44] ss:$8 sps:$4 sm:$0xff]   ;;  %v667_v15 = vld [vmem:[#allocation2 + $0x40] ss:$8 sps:$4 sm:$0xff]   ;;  %v668_v16 = vld [vmem:[#allocation2 + $0x54] ss:$8 sps:$4 sm:$0xff]  }
  0x19   :  { %572 = vmatmul.mubr.msk.bf16.vlgmr.msra.gmra.mrb[0].mxu0 %vm66_vm1, %v43_v7  ;;  %v670_v17 = vld [vmem:[#allocation2 + $0x50] ss:$8 sps:$4 sm:$0xff]   ;;  %v671_v18 = vld [vmem:[#allocation2 + $0x64] ss:$8 sps:$4 sm:$0xff]   ;;  %v673_v19 = vld [vmem:[#allocation2 + $0x60] ss:$8 sps:$4 sm:$0xff]  }
  0x1a   :  { %v674_v20 = vld [vmem:[#allocation2 + $0x74] ss:$8 sps:$4 sm:$0xff]   ;;  %v676_v21 = vld [vmem:[#allocation2 + $0x70] ss:$8 sps:$4 sm:$0xff]   ;;  %v677_v22 = vld [vmem:[#allocation2 + $0x84] ss:$8 sps:$4 sm:$0xff]  }
  0x1b   :  { %329 = vmatpush1.bf16.msra.mxu1 %v658_v9  ;;  %v679_v23 = vld [vmem:[#allocation2 + $0x80] ss:$8 sps:$4 sm:$0xff]   ;;  %v680_v24 = vld [vmem:[#allocation2 + $0x94] ss:$8 sps:$4 sm:$0xff]   ;;  %v682_v25 = vld [vmem:[#allocation2 + $0x90] ss:$8 sps:$4 sm:$0xff]  }
  0x1c   :  { %330 = vmatprep.subr.bf16.mxu1 %v659_v10  ;;  %v683_v26 = vld [vmem:[#allocation2 + $0xa4] ss:$8 sps:$4 sm:$0xff]   ;;  %v685_v27 = vld [vmem:[#allocation2 + $0xa0] ss:$8 sps:$4 sm:$0xff]   ;;  %v686_v28 = vld [vmem:[#allocation2 + $0xb4] ss:$8 sps:$4 sm:$0xff]  }
  0x1d   :  { %v688_v29 = vld [vmem:[#allocation2 + $0xb0] ss:$8 sps:$4 sm:$0xff]   ;;  %v689_v30 = vld [vmem:[#allocation2 + $0xc4] ss:$8 sps:$4 sm:$0xff]   ;;  %v691_v31 = vld [vmem:[#allocation2 + $0xc0] ss:$8 sps:$4 sm:$0xff]  }
  0x1e   :  { %v692_v32 = vld [vmem:[#allocation2 + $0xd4] ss:$8 sps:$4 sm:$0xff]   ;;  %v694_v33 = vld [vmem:[#allocation2 + $0xd0] ss:$8 sps:$4 sm:$0xff]   ;;  %v695_v34 = vld [vmem:[#allocation2 + $0xe4] ss:$8 sps:$4 sm:$0xff]  }
  0x1f   :  { %331 = vmatpush1.bf16.msra.mxu1 %v661_v11  ;;  %v697_v35 = vld [vmem:[#allocation2 + $0xe0] ss:$8 sps:$4 sm:$0xff]   ;;  %v698_v36 = vld [vmem:[#allocation2 + $0xf4] ss:$8 sps:$4 sm:$0xff]   ;;  %v700_v37 = vld [vmem:[#allocation2 + $0xf0] ss:$8 sps:$4 sm:$0xff]  }
  0x20   :  { %332 = vmatprep.subr.bf16.mxu1 %v662_v12  ;;  %v701_v38 = vld [vmem:[%s909_s5 + $0x40] sm:$0xff]   ;;  %v703_v40 = vld [vmem:[%s909_s5 + $0x48] sm:$0xff]   ;;  %v706_v43 = vld [vmem:[%s909_s5 + $0x10] sm:$0xff]   ;;  %v49_v51 = vshrl.u32 %v48_v50, 7  ;;  %vm552_vm2 = vcmask 130048  }
  0x21   :  { %v702_v39 = vld [vmem:[%s909_s5] sm:$0xff]   ;;  %623 = vmatprep.subr.bf16.mxu0 %v701_v38  ;;  %v704_v41 = vld [vmem:[%s909_s5 + $0x8] sm:$0xff]   ;;  %v707_v44 = vld [vmem:[%s909_s5 + $0x58] sm:$0xff]  }
  0x22   :  { %624 = vmatpush3.bf16.msra.mxu0 %v702_v39  ;;  %v708_v45 = vld [vmem:[%s909_s5 + $0x18] sm:$0xff]   ;;  %v709_v46 = vld [vmem:[%s909_s5 + $0x60] sm:$0xff]   ;;  %v711_v48 = vld [vmem:[%s909_s5 + $0x68] sm:$0xff]   ;;  %v50_v52 = vsub.s32 0, %v49_v51  ;;  %v54_v54 = vsub.s32 1, %v49_v51 }
  0x23   :  { %333 = vmatpush1.bf16.msra.mxu1 %v664_v13  ;;  %625 = vmatprep.subr.bf16.mxu0 %v703_v40  ;;  %v710_v47 = vld [vmem:[%s909_s5 + $0x20] sm:$0xff]   ;;  %v712_v49 = vld [vmem:[%s909_s5 + $0x28] sm:$0xff]   ;;  %v713_v3 = vld [vmem:[%s909_s5 + $0x70] sm:$0xff]  }
  0x24   :  { %334 = vmatprep.subr.bf16.mxu1 %v665_v14  ;;  %v46_v53 = vld [vmem:[%s906_s2] sm:$0x3]  ;;  %v714_v4 = vld [vmem:[%s909_s5 + $0x30] sm:$0xff]   ;;  %v715_v5 = vld [vmem:[%s909_s5 + $0x78] sm:$0xff]  }
  0x25   :  { %v51_v55 = vrot.slane %v46_v53, %v50_v52  ;;  %v55_v56 = vrot.slane %v46_v53, %v54_v54  ;;  %v716_v6 = vld [vmem:[%s909_s5 + $0x38] sm:$0xff]   ;;  %v154_v7 = vld [vmem:[%s908_s4] sm:$0x3]  ;;  %s773_s4 = smov [#allocation5]  }
  0x26   :  { %626 = vmatpush3.bf16.msra.mxu0 %v704_v41  ;;  %v159_v8 = vrot.slane %v154_v7, %v50_v52  ;;  %v163_v9 = vrot.slane %v154_v7, %v54_v54  ;;  %s560_s28 = sshll.u32 %s773_s4, 4  ;;  %s561_s28 = int_to_ptr.vmem [resolvable:$true] %s560_s28 }
  0x27   :  { %335 = vmatpush1.bf16.msra.mxu1 %v667_v15  ;;  %627 = vmatprep.subr.bf16.mxu0 %v705_v42  ;;  %s743_s29 = scalar_lea.vmem %s561_s28, 128  ;;  %p748_p9 = scmp.lt.s32.totalorder %s561_s28, %s561_s28 }
  0x28   :  { %336 = vmatprep.subr.bf16.mxu1 %v668_v16  ;;  %p744_p8 = scmp.ne.s32.totalorder %s561_s28, %s743_s29  ;;  %p749_p10 = scmp.lt.s32.totalorder %s743_s29, %s743_s29 }
  0x2a   :  { %628 = vmatpush3.bf16.msra.mxu0 %v706_v43  ;;  %p750_p11 = por %p749_p10, %p748_p9 }
  0x2b   :  { %337 = vmatpush1.bf16.msra.mxu1 %v670_v17  ;;  %629 = vmatprep.subr.bf16.mxu0 %v707_v44 }
  0x2c   :  { %338 = vmatprep.subr.bf16.mxu1 %v671_v18  ;;  %p751_p12 = pnand %p750_p11, %p744_p8 }
  0x2e   :  { %630 = vmatpush3.bf16.msra.mxu0 %v708_v45 }
  0x2f   :  { %339 = vmatpush1.bf16.msra.mxu1 %v673_v19  ;;  %631 = vmatprep.subr.bf16.mxu0 %v709_v46 }
  0x30   :  { %340 = vmatprep.subr.bf16.mxu1 %v674_v20 }
  0x32   :  { %632 = vmatpush3.bf16.msra.mxu0 %v710_v47 }
  0x33   :  { %341 = vmatpush1.bf16.msra.mxu1 %v676_v21  ;;  %633 = vmatprep.subr.bf16.mxu0 %v711_v48  ;;  %v605_v21 = vld [vmem:[%s910_s6] ss:$0 sm:$0xff] }
  0x34   :  { %342 = vmatprep.subr.bf16.mxu1 %v677_v22 }
  0x36   :  { %634 = vmatpush3.bf16.msra.mxu0 %v712_v49 }
  0x37   :  { %343 = vmatpush1.bf16.msra.mxu1 %v679_v23  ;;  %635 = vmatprep.subr.bf16.mxu0 %v713_v3 }
  0x38   :  { %344 = vmatprep.subr.bf16.mxu1 %v680_v24 }
  0x3a   :  { %636 = vmatpush3.bf16.msra.mxu0 %v714_v4 }
  0x3b   :  { %345 = vmatpush1.bf16.msra.mxu1 %v682_v25  ;;  %637 = vmatprep.subr.bf16.mxu0 %v715_v5 }
  0x3c   :  { %346 = vmatprep.subr.bf16.mxu1 %v683_v26 }
  0x3e   :  { %638 = vmatpush3.bf16.msra.mxu0 %v716_v6 }
  0x3f   :  { %347 = vmatpush1.bf16.msra.mxu1 %v685_v27 }
  0x40   :  { %348 = vmatprep.subr.bf16.mxu1 %v686_v28 }
  0x43   :  { %349 = vmatpush1.bf16.msra.mxu1 %v688_v29 }
  0x44   :  { %350 = vmatprep.subr.bf16.mxu1 %v689_v30 }
  0x47   :  { %351 = vmatpush1.bf16.msra.mxu1 %v691_v31 }
  0x48   :  { %352 = vmatprep.subr.bf16.mxu1 %v692_v32 }
  0x4b   :  { %353 = vmatpush1.bf16.msra.mxu1 %v694_v33 }
  0x4c   :  { %354 = vmatprep.subr.bf16.mxu1 %v695_v34 }
  0x4f   :  { %355 = vmatpush1.bf16.msra.mxu1 %v697_v35 }
  0x50   :  { %356 = vmatprep.subr.bf16.mxu1 %v698_v36 }
  0x53   :  { %357 = vmatpush1.bf16.msra.mxu1 %v700_v37 }
  0xec   :  { %v111_v57 = vpop.f32.mrb[0].mxu0 }
  0xed   :  { %v112_v58 = vadd.f32 %v111_v57, %v51_v55  ;;  %v113_v59 = vpop.f32.mrb[1].mxu0 }
  0xee   :  { %v114_v60 = vadd.f32 %v113_v59, %v55_v56  ;;  %v115_v61 = vpop.f32.mrb[2].mxu0 }
  0xef   :  { %v118_v62 = vmax.f32 %v112_v58, 0.0  ;;  %v116_v63 = vpop.f32.mrb[3].mxu0 }
  0xf0   :  { %v119_v0 = vmax.f32 %v114_v60, 0.0 }
  0xf1   :  { %v120_v2 = vpack.c.bf16 %v118_v62, %v118_v62 }
  0xf2   :  { %v121_v1 = vpack.c.bf16 %v119_v0, %v119_v0 }
  0xf4   :  { %358 = vmatprep.mubr.bf16.mxu1 %v121_v1 }
  0xf5   :  { %359 = vmatmul.mubr.bf16.vlgmr.msra.gmra.mrb[0].mxu1 %v120_v2 }
 0x1c8   :  { %v360_v10 = vpop.f32.mrb[0].mxu1 }
 0x1c9   :  { %v361_v11 = vadd.f32 %v360_v10, %v159_v8  ;;  %v362_v12 = vpop.f32.mrb[1].mxu1 }
 0x1ca   :  { %v363_v13 = vadd.f32 %v362_v12, %v163_v9  ;;  %v364_v14 = vpop.f32.mrb[2].mxu1 }
 0x1cb   :  { %v367_v15 = vmax.f32 %v361_v11, 0.0  ;;  %v365_v16 = vpop.f32.mrb[3].mxu1 }
 0x1cc   :  { %v368_v17 = vmax.f32 %v363_v13, 0.0 }
 0x1cd   :  { %v369_v19 = vpack.c.bf16 %v367_v15, %v367_v15 }
 0x1ce   :  { %v370_v18 = vpack.c.bf16 %v368_v17, %v368_v17 }
 0x1d0   :  { %538 = vmatprep.mubr.bf16.mxu0 %v370_v18 }
 0x1d1   :  { %539 = vmatmul.mubr.bf16.vlgmr.msra.gmra.mrb[4].mxu0 %v369_v19 }
 0x2a4   :  { %v639_v20 = vpop.f32.mrb[4].mxu0 }
 0x2a5   :  { %v640_v22 = vpop.f32.mrb[5].mxu0 }
 0x2a6   :  { %v641_v23 = vadd.f32 %v640_v22, %v639_v20  ;;  %v642_v24 = vpop.f32.mrb[6].mxu0 }
 0x2a7   :  { %v643_v25 = vpop.f32.mrb[7].mxu0 }
 0x2a8   :  { %v541_v26 = vadd.f32 %v641_v23, %v605_v21 }
 0x2aa   :  { %v622_v27 = vmul.f32 -1.442695, %v541_v26 }
 0x2ac   :  { %717 = vpow2.f32 %v622_v27 }
 0x2b6   :  { %v718_v28 = vpop.eup %717 }
 0x2b7   :  { %v549_v29 = vadd.f32 1.0, %v718_v28 }
 0x2b9   :  { %719 = vrcp.f32 %v549_v29 }
 0x2c3   :  { %v720_v30 = vpop.eup %719 }
 0x2c4   :  { %553 = vst.msk [vmem:[#allocation5] sm:$0xff] %vm552_vm2, %v720_v30 }
 0x2c5   :  { %754 = shalt.err (!%p751_p12)
}
 0x2c6   :  { %s755_s8 = scalar_lea.hbm %s911_s7, 128 }
 0x2c7   :  { %p756_p13 = scmp.ne.s32.totalorder %s911_s7, %s755_s8  ;;  %p759_p0 = scmp.lt.u32.totalorder %s755_s8, %s911_s7 }
 0x2c9   :  { %p761_p1 = pnand %p759_p0, %p756_p13 }
 0x2cb   :  { %764 = shalt.err (!%p761_p1)
}
 0x2cc   :  { %563 = dma.vmem_to_hbm [thread:$0]  %s561_s28, 128, %s911_s7, [#allocation4]  }
 0x2cd   :  { %767 = dma.done.wait [#allocation4], 128  }
 0x2ce   :  { %768 = vsyncadd [#allocation4], 4294967168 }
 0x2cf   :  { %567 = vsyncpa [#allocation3], 1 }
 0x2d0   :  { %568 = vsyncpa [#allocation4], 1 }

</bundles_post_ra>
